<compile_context>
chip_gen: v7x
topology: tpu7x:2x2x1
jax: 0.10.0
libtpu: 0.0.40
codegen_flags: <defaults>
</compile_context>

<pallas_src>
import functools

import jax
import jax.numpy as jnp
from jax import lax
from jax.experimental import pallas as pl
from jax.experimental.pallas import tpu as pltpu

MUL = 2          # ResNeXtBottleNeck.mul
BN_EPS = 1e-5    # nn.BatchNorm2d default eps


# ---------------------------------------------------------------------------
# Hardware-aware knobs (safe fallbacks if query APIs are unavailable).
# ---------------------------------------------------------------------------
def _vmem_limit_bytes():
    try:
        cap = pltpu.get_tpu_info().vmem_capacity_bytes
    except Exception:
        cap = 128 * 1024 * 1024
    # ~96 MiB on 128-MiB chips (v5e/v6e), ~48 MiB on v7x's 64-MiB VMEM.
    return int(min(96 * 1024 * 1024, cap * 3 // 4))


def _chunk_target():
    # MXU is 256-wide on v6e/v7x, 128-wide on v5e and older.
    try:
        kind = jax.devices()[0].device_kind.lower()
        return 128 if any(v in kind for v in ("v2", "v3", "v4", "v5")) else 256
    except Exception:
        return 128


def _pick_chunk(gw, group_size, target):
    """Largest multiple of the conv-group size that divides gw and is <= target."""
    best = group_size
    c = group_size
    while c <= gw:
        if gw % c == 0 and c <= target:
            best = c
        c += group_size
    return best


def _stage1_row_tile(m, target=512):
    # Fixed tile + cdiv grid (Pallas masks the partial last block); never a
    # whole-M block, so the stage-1 VMEM footprint stays bounded.
    return m if m <= target else target


# ---------------------------------------------------------------------------
# Stage-1 kernels: strided 1x1 conv + BN + ReLU, optionally fused with the
# 1x1 projection shortcut + BN via a concatenated weight.  x block: (TM, Cin).
# ---------------------------------------------------------------------------
def _stage1_proj_kernel(x_ref, w_ref, s1_ref, b1_ref, ss_ref, bs_ref,
                        h1_ref, sc_ref):
    gw = h1_ref.shape[-1]
    # One MXU weight push over the shared x tile: w_ref = [w1 | ws].
    h = jnp.dot(x_ref[...], w_ref[...], preferred_element_type=jnp.float32)
    h1 = h[:, :gw]
    sc = h[:, gw:]
    h1_ref[...] = jnp.maximum(h1 * s1_ref[...] + b1_ref[...], 0.0).astype(h1_ref.dtype)
    sc_ref[...] = (sc * ss_ref[...] + bs_ref[...]).astype(sc_ref.dtype)


def _stage1_id_kernel(x_ref, w1_ref, s1_ref, b1_ref, h1_ref):
    h = jnp.dot(x_ref[...], w1_ref[...], preferred_element_type=jnp.float32)
    h1_ref[...] = jnp.maximum(h * s1_ref[...] + b1_ref[...], 0.0).astype(h1_ref.dtype)


# ---------------------------------------------------------------------------
# Tail kernel: grouped 3x3 conv (diagonal-chunked, K-stacked taps) + BN +
# ReLU, 1x1 conv + BN, add shortcut, ReLU.  One grid step = one image,
# flattened to (Ho*Wo, C).  3x3 halo via bf16 row shifts * precomputed masks.
# ---------------------------------------------------------------------------
def _tail_kernel(h1_ref, sc_ref, msk_ref, w2_ref, s2_ref, b2_ref,
                 w3_ref, s3_ref, b3_ref, o_ref, *, Wo, chunk):
    HW, GW = h1_ref.shape
    nchunks = GW // chunk

    h1 = h1_ref[...]                      # (HW, GW) bf16 (no f32 upcast)
    msk = msk_ref[...]                    # (HW, 9)  bf16 {0,1} border masks

    # 9 spatial taps: flat row shift + one broadcast multiply each.
    taps = []
    t = 0
    for dy in (-1, 0, 1):
        for dx in (-1, 0, 1):
            s = dy * Wo + dx
            if s == 0:
                taps.append(h1)
            else:
                taps.append(jnp.roll(h1, -s, axis=0) * msk[:, t:t + 1])
            t += 1

    # Grouped 3x3 conv: one K-stacked matmul per diagonal channel chunk of
    # the block-diagonal weight (skips all-zero cross-chunk blocks).
    outs = []
    for c in range(nchunks):
        lo = c * chunk
        if nchunks == 1:
            stack = jnp.concatenate(taps, axis=-1)                     # (HW, 9*GW)
        else:
            stack = jnp.concatenate([tp[:, lo:lo + chunk] for tp in taps], axis=-1)
        outs.append(jnp.dot(stack, w2_ref[c], preferred_element_type=jnp.float32))
    acc = outs[0] if nchunks == 1 else jnp.concatenate(outs, axis=-1)  # (HW, GW) f32

    h2 = jnp.maximum(acc * s2_ref[...] + b2_ref[...], 0.0)

    out3 = jnp.dot(h2.astype(jnp.bfloat16), w3_ref[...],
                   preferred_element_type=jnp.float32)                 # (HW, Cout)
    out3 = out3 * s3_ref[...] + b3_ref[...]

    sc = sc_ref[...].astype(jnp.float32)
    o_ref[...] = jnp.maximum(out3 + sc, 0.0).astype(o_ref.dtype)       # bf16 store


# ---------------------------------------------------------------------------
# Wrapper
# ---------------------------------------------------------------------------
def resnext_bottleneck_forward(x_nchw, params, *, cardinality, stride, has_proj):
    # NCHW -> NHWC; stride subsample + bf16 cast fused into one XLA pass.
    # TODO(synk): fold the layout change + stride directly into the stage-1
    # BlockSpec / index_map to avoid this host-side pass entirely.
    x = jnp.transpose(x_nchw, (0, 2, 3, 1))
    if stride != 1:
        x = x[:, ::stride, ::stride, :]
    x = x.astype(jnp.bfloat16)
    N, Ho, Wo, Cin = x.shape
    GW = params["w1"].shape[1]
    Cout = params["w3"].shape[1]
    HW = Ho * Wo
    M = N * HW

    cp = pltpu.CompilerParams(dimension_semantics=("parallel",),
                              vmem_limit_bytes=_vmem_limit_bytes())

    def resident(a):  # whole array VMEM-resident (constant block index)
        return pl.BlockSpec(a.shape, lambda i, _nd=a.ndim: (0,) * _nd)

    # ---- stage 1: strided 1x1 conv + BN + ReLU (+ fused projection) --------
    # NOTE: real ResNeXt widths have GW >= 128 so outputs are lane-dense; the
    # tiny test widths below use masked stores, which is acceptable here.
    x_flat = x.reshape(M, Cin)
    TM = _stage1_row_tile(M)
    grid1 = (pl.cdiv(M, TM),)
    w1 = params["w1"].astype(jnp.bfloat16)

    if has_proj:
        w_cat = jnp.concatenate([w1, params["ws"].astype(jnp.bfloat16)], axis=1)
        h1_flat, sc_flat = pl.pallas_call(
            _stage1_proj_kernel,
            out_shape=(jax.ShapeDtypeStruct((M, GW), jnp.bfloat16),
                       jax.ShapeDtypeStruct((M, Cout), jnp.bfloat16)),
            grid=grid1,
            in_specs=[pl.BlockSpec((TM, Cin), lambda i: (i, 0)),
                      resident(w_cat), resident(params["s1"]), resident(params["b1"]),
                      resident(params["ss"]), resident(params["bs"])],
            out_specs=(pl.BlockSpec((TM, GW), lambda i: (i, 0)),
                       pl.BlockSpec((TM, Cout), lambda i: (i, 0))),
            compiler_params=cp,
        )(x_flat, w_cat, params["s1"], params["b1"], params["ss"], params["bs"])
    else:
        h1_flat = pl.pallas_call(
            _stage1_id_kernel,
            out_shape=jax.ShapeDtypeStruct((M, GW), jnp.bfloat16),
            grid=grid1,
            in_specs=[pl.BlockSpec((TM, Cin), lambda i: (i, 0)),
                      resident(w1), resident(params["s1"]), resident(params["b1"])],
            out_specs=pl.BlockSpec((TM, GW), lambda i: (i, 0)),
            compiler_params=cp,
        )(x_flat, w1, params["s1"], params["b1"])
        # Identity shortcut (stride == 1, Cin == Cout): reuse the bf16 input.
        sc_flat = x_flat

    # ---- precomputed 3x3 border masks: (HW, 9) bf16, VMEM-resident ---------
    p = jnp.arange(HW, dtype=jnp.int32)
    yy, xx = p // Wo, p % Wo
    masks = []
    for dy in (-1, 0, 1):
        for dx in (-1, 0, 1):
            masks.append((yy + dy >= 0) & (yy + dy < Ho) &
                         (xx + dx >= 0) & (xx + dx < Wo))
    msk = jnp.stack(masks, axis=-1).astype(jnp.bfloat16)             # (HW, 9)

    # ---- block-diagonal grouped weight -> per-chunk K-stacked form ---------
    chunk = _pick_chunk(GW, GW // cardinality, _chunk_target())
    nchunks = GW // chunk
    w2d = params["w2"]                                               # (3,3,GW,GW)
    w2_stk = jnp.stack(
        [w2d[:, :, c * chunk:(c + 1) * chunk, c * chunk:(c + 1) * chunk]
         .reshape(9 * chunk, chunk) for c in range(nchunks)],
        axis=0).astype(jnp.bfloat16)                                 # (nc, 9*chunk, chunk)
    w3 = params["w3"].astype(jnp.bfloat16)
    Csc = sc_flat.shape[-1]

    # ---- tail: grouped 3x3 + BN + ReLU, 1x1 + BN, + shortcut, ReLU ---------
    # TODO(synk): for very large Ho*Wo (v7x 64-MiB VMEM), tile the tail over
    # row groups with a one-row halo instead of one whole image per grid step.
    out_flat = pl.pallas_call(
        functools.partial(_tail_kernel, Wo=Wo, chunk=chunk),
        out_shape=jax.ShapeDtypeStruct((M, Cout), jnp.bfloat16),
        grid=(N,),
        in_specs=[pl.BlockSpec((HW, GW), lambda n: (n, 0)),
                  pl.BlockSpec((HW, Csc), lambda n: (n, 0)),
                  resident(msk),
                  resident(w2_stk), resident(params["s2"]), resident(params["b2"]),
                  resident(w3), resident(params["s3"]), resident(params["b3"])],
        out_specs=pl.BlockSpec((HW, Cout), lambda n: (n, 0)),
        compiler_params=cp,
    )(h1_flat, sc_flat, msk, w2_stk, params["s2"], params["b2"],
      w3, params["s3"], params["b3"])

    out = out_flat.reshape(N, Ho, Wo, Cout)
    return jnp.transpose(out, (0, 3, 1, 2)).astype(jnp.float32)      # NHWC -> NCHW


# ---------------------------------------------------------------------------
# Deterministic synthetic parameters (shapes dictated by the module __init__)
# ---------------------------------------------------------------------------
def init_params(key, in_planes, group_width, cardinality, stride):
    GW = group_width
    cg = GW // cardinality
    Cout = GW * MUL
    ks = jax.random.split(key, 8)

    def nrm(k, shape, scale=0.2):
        return scale * jax.random.normal(k, shape, dtype=jnp.float32)

    # conv weights stored channels-last (HWIO-style, squeezed for 1x1)
    w1 = nrm(ks[0], (in_planes, GW))                       # conv1
    w2_groups = nrm(ks[1], (cardinality, 3, 3, cg, cg))    # conv2 grouped weight
    w3 = nrm(ks[2], (GW, Cout))                            # conv3

    # block-diagonal dense form of the grouped conv weight
    w2_dense = jnp.zeros((3, 3, GW, GW), jnp.float32)
    for g in range(cardinality):
        w2_dense = w2_dense.at[:, :, g * cg:(g + 1) * cg,
                               g * cg:(g + 1) * cg].set(w2_groups[g])
    # grouped HWIO form (for the pure-JAX reference)
    w2_hwio = jnp.concatenate([w2_groups[g] for g in range(cardinality)], axis=-1)

    def bn(k, C):
        kg, kb, km, kv = jax.random.split(k, 4)
        gamma = 1.0 + 0.1 * jax.random.normal(kg, (C,), jnp.float32)
        beta = 0.1 * jax.random.normal(kb, (C,), jnp.float32)
        mean = 0.1 * jax.random.normal(km, (C,), jnp.float32)
        var = jax.random.uniform(kv, (C,), jnp.float32, minval=0.5, maxval=1.5)
        scale = gamma / jnp.sqrt(var + BN_EPS)
        bias = beta - mean * scale
        return scale.reshape(1, C), bias.reshape(1, C)

    s1, b1 = bn(ks[3], GW)
    s2, b2 = bn(ks[4], GW)
    s3, b3 = bn(ks[5], Cout)

    has_proj = (stride != 1) or (in_planes != Cout)
    params = dict(w1=w1, s1=s1, b1=b1, w2=w2_dense, s2=s2, b2=b2,
                  w3=w3, s3=s3, b3=b3)
    ref_w = dict(w1=w1, w2_hwio=w2_hwio, w3=w3)
    if has_proj:
        params["ws"] = nrm(ks[6], (in_planes, Cout))
        params["ss"], params["bs"] = bn(ks[7], Cout)
        ref_w["ws"] = params["ws"]
    return params, ref_w, has_proj


# ---------------------------------------------------------------------------
# Pure-JAX reference (mirrors the kernels' bf16 rounding points so tolerances
# stay tight)
# ---------------------------------------------------------------------------
def _bf16(x):
    return x.astype(jnp.bfloat16).astype(jnp.float32)


def reference_forward(x_nchw, params, ref_w, *, cardinality, stride, has_proj):
    x = jnp.transpose(x_nchw, (0, 2, 3, 1)).astype(jnp.float32)
    xb = _bf16(x)
    dn = ("NHWC", "HWIO", "NHWC")

    def conv1x1(a, w, s):
        return lax.conv_general_dilated(a, w.reshape(1, 1, *w.shape), (s, s),
                                        "VALID", dimension_numbers=dn)

    h = conv1x1(xb, _bf16(ref_w["w1"]), stride)
    h = _bf16(jnp.maximum(h * params["s1"][0] + params["b1"][0], 0.0))
    h = lax.conv_general_dilated(h, _bf16(ref_w["w2_hwio"]), (1, 1),
                                 ((1, 1), (1, 1)), dimension_numbers=dn,
                                 feature_group_count=cardinality)
    h = _bf16(jnp.maximum(h * params["s2"][0] + params["b2"][0], 0.0))
    h = conv1x1(h, _bf16(ref_w["w3"]), 1)
    h = h * params["s3"][0] + params["b3"][0]
    if has_proj:
        sc = conv1x1(xb, _bf16(ref_w["ws"]), stride)
        sc = _bf16(sc * params["ss"][0] + params["bs"][0])
    else:
        sc = xb[:, ::stride, ::stride, :]
    out = _bf16(jnp.maximum(h + sc, 0.0))     # kernel writes bf16 output
    return jnp.transpose(out, (0, 3, 1, 2))


if __name__ == "__main__":
    key = jax.random.PRNGKey(0)
    configs = [
        # (N, in_planes, H, W, group_width, cardinality, stride)
        (2, 32, 16, 16, 16, 4, 1),   # identity shortcut
        (2, 8, 16, 16, 16, 4, 2),    # projection shortcut, stride 2
    ]
    for cfg in configs:
        N, Cin, H, W, GWc, card, stride = cfg
        key, kx, kp = jax.random.split(key, 3)
        x = jax.random.normal(kx, (N, Cin, H, W), dtype=jnp.float32)
        params, ref_w, has_proj = init_params(kp, Cin, GWc, card, stride)

        out = resnext_bottleneck_forward(x, params, cardinality=card,
                                         stride=stride, has_proj=has_proj)
        out = jax.block_until_ready(out)

        ref = reference_forward(x, params, ref_w, cardinality=card,
                                stride=stride, has_proj=has_proj)
        assert out.shape == (N, GWc * MUL, H // stride, W // stride), out.shape
        diff = jnp.abs(out - ref)
        tol = 5e-2 + 1e-2 * jnp.abs(ref)      # abs + bf16-ULP relative slack
        assert bool(jnp.all(diff <= tol)), (cfg, float(jnp.max(diff)))
    print("KERNEL_OK")
</pallas_src>

<mosaic_0001>
module attributes {stable_mosaic.version = 11 : i64} {
  func.func @_stage1_id_kernel(%arg0: i32, %arg1: memref<512x32xbf16, #tpu.memory_space<vmem>>, %arg2: memref<32x16xbf16, #tpu.memory_space<vmem>>, %arg3: memref<1x16xf32, #tpu.memory_space<vmem>>, %arg4: memref<1x16xf32, #tpu.memory_space<vmem>>, %arg5: memref<512x16xbf16, #tpu.memory_space<vmem>>) attributes {dimension_semantics = [#tpu.dimension_semantics<parallel>], iteration_bounds = array<i64: 1>, scalar_prefetch = 0 : i64, scratch_operands = 0 : i64, tpu.core_type = #tpu.core_type<tc>, window_params = [{transform_indices = @transform_0, window_bounds = array<i64: 512, 32>}, {pipeline_mode = #tpu.pipeline_mode<synchronous>, transform_indices = @transform_1, window_bounds = array<i64: 32, 16>}, {pipeline_mode = #tpu.pipeline_mode<synchronous>, transform_indices = @transform_2, window_bounds = array<i64: 1, 16>}, {pipeline_mode = #tpu.pipeline_mode<synchronous>, transform_indices = @transform_3, window_bounds = array<i64: 1, 16>}, {transform_indices = @transform_4, window_bounds = array<i64: 512, 16>}]} {
    %c0 = arith.constant 0 : index
    %c0_0 = arith.constant 0 : index
    %0 = vector.load %arg1[%c0, %c0_0] : memref<512x32xbf16, #tpu.memory_space<vmem>>, vector<512x32xbf16>
    %c0_1 = arith.constant 0 : index
    %c0_2 = arith.constant 0 : index
    %1 = vector.load %arg2[%c0_1, %c0_2] : memref<32x16xbf16, #tpu.memory_space<vmem>>, vector<32x16xbf16>
    %cst = arith.constant dense<0.000000e+00> : vector<512x16xf32>
    %2 = tpu.matmul %0, %1, %cst {dimension_numbers = #tpu.dot_dimension_numbers<[1], [0], [0], [1], [0, 0, 1, 1], [], []>} : vector<512x32xbf16>, vector<32x16xbf16>, vector<512x16xf32> -> vector<512x16xf32>
    %c0_3 = arith.constant 0 : index
    %c0_4 = arith.constant 0 : index
    %3 = vector.load %arg3[%c0_3, %c0_4] : memref<1x16xf32, #tpu.memory_space<vmem>>, vector<1x16xf32>
    %4 = vector.broadcast %3 : vector<1x16xf32> to vector<512x16xf32>
    %5 = arith.mulf %2, %4 : vector<512x16xf32>
    %c0_5 = arith.constant 0 : index
    %c0_6 = arith.constant 0 : index
    %6 = vector.load %arg4[%c0_5, %c0_6] : memref<1x16xf32, #tpu.memory_space<vmem>>, vector<1x16xf32>
    %7 = vector.broadcast %6 : vector<1x16xf32> to vector<512x16xf32>
    %8 = arith.addf %5, %7 : vector<512x16xf32>
    %cst_7 = arith.constant 0.000000e+00 : f32
    %9 = vector.broadcast %cst_7 : f32 to vector<512x16xf32>
    %10 = arith.maximumf %8, %9 : vector<512x16xf32>
    %11 = arith.truncf %10 : vector<512x16xf32> to vector<512x16xbf16>
    %c0_8 = arith.constant 0 : index
    %c0_9 = arith.constant 0 : index
    %12 = vector.load %arg5[%c0_8, %c0_9] : memref<512x16xbf16, #tpu.memory_space<vmem>>, vector<512x16xbf16>
    tpu.vector_store %arg5[%c0_8, %c0_9], %11 {strides = array<i32>} : memref<512x16xbf16, #tpu.memory_space<vmem>>, vector<512x16xbf16>,
    return
  }
  func.func @transform_0(%arg0: i32) -> (i32, i32) {
    %c0_i32 = arith.constant 0 : i32
    %c0_i32_0 = arith.constant 0 : i32
    return %arg0, %c0_i32 : i32, i32
  }
  func.func @transform_1(%arg0: i32) -> (i32, i32) {
    %c0_i32 = arith.constant 0 : i32
    %c0_i32_0 = arith.constant 0 : i32
    %c0_i32_1 = arith.constant 0 : i32
    return %c0_i32, %c0_i32_0 : i32, i32
  }
  func.func @transform_2(%arg0: i32) -> (i32, i32) {
    %c0_i32 = arith.constant 0 : i32
    %c0_i32_0 = arith.constant 0 : i32
    %c0_i32_1 = arith.constant 0 : i32
    return %c0_i32, %c0_i32_0 : i32, i32
  }
  func.func @transform_3(%arg0: i32) -> (i32, i32) {
    %c0_i32 = arith.constant 0 : i32
    %c0_i32_0 = arith.constant 0 : i32
    %c0_i32_1 = arith.constant 0 : i32
    return %c0_i32, %c0_i32_0 : i32, i32
  }
  func.func @transform_4(%arg0: i32) -> (i32, i32) {
    %c0_i32 = arith.constant 0 : i32
    %c0_i32_0 = arith.constant 0 : i32
    return %arg0, %c0_i32 : i32, i32
  }
}

</mosaic_0001>

<bundles_post_ra>
// kernel: tpu_custom_call.1
= control target key start
LH: loop header
LB: loop body
LE: loop exit
PB: predicated region body
PF: predicated region fallthrough
CT: control target
= control target key end

     0   :  { %9 = vsyncpa [#allocation3], 0  ;;  %s2039_s0 = inlined_call_operand.hbm [shape: bf16[512,32], index: 0, kind: input, shape index: {}]   ;;  %s2040_s1 = inlined_call_operand.hbm [shape: bf16[32,16], index: 1, kind: input, shape index: {}]   ;;  %s2041_s2 = inlined_call_operand.hbm [shape: f32[1,16], index: 2, kind: input, shape index: {}]   ;;  %s2042_s3 = inlined_call_operand.hbm [shape: f32[1,16], index: 3, kind: input, shape index: {}]   ;;  %s2043_s4 = inlined_call_operand.hbm [shape: bf16[512,16], index: 4, kind: output, shape index: {}]  }
   0x1   :  { %10 = vsyncpa [#allocation6], 0 }
   0x2   :  { %11 = vsyncpa [#allocation9], 0 }
   0x3   :  { %12 = vsyncpa [#allocation4], 0  ;;  %s1703_s15 = smov [#allocation5]   ;;  %s1704_s17 = smov [#allocation2]  }
   0x4   :  { %s30_s16 = sshll.u32 %s1703_s15, 4  ;;  %s18_s18 = sshll.u32 %s1704_s17, 4  ;;  %s31_s16 = int_to_ptr.vmem [resolvable:$true] %s30_s16  ;;  %s1735_s18 = int_to_ptr.vmem [resolvable:$true] %s18_s18 }
   0x5   :  { %s1585_s21 = scalar_lea.hbm %s2040_s1, 256 }
   0x6   :  { %p1586_p0 = scmp.ne.s32.totalorder %s2040_s1, %s1585_s21  ;;  %p1589_p1 = scmp.lt.u32.totalorder %s1585_s21, %s2040_s1 }
   0x8   :  { %p1591_p2 = pnand %p1589_p1, %p1586_p0 }
   0xa   :  { %1594 = shalt.err (!%p1591_p2)
}
   0xb   :  { %s1595_s26 = scalar_lea.vmem %s31_s16, 256  ;;  %p1600_p4 = scmp.lt.s32.totalorder %s31_s16, %s31_s16 }
   0xc   :  { %p1596_p3 = scmp.ne.s32.totalorder %s31_s16, %s1595_s26  ;;  %p1601_p5 = scmp.lt.s32.totalorder %s1595_s26, %s1595_s26 }
   0xe   :  { %p1602_p6 = por %p1601_p5, %p1600_p4 }
  0x10   :  { %p1603_p7 = pnand %p1602_p6, %p1596_p3 }
  0x12   :  { %1606 = shalt.err (!%p1603_p7)
}
  0x13   :  { %s1705_s27 = smov 64   ;;  %s1706_s28 = smov 4  }
  0x14   :  { %36 = dma.hbm_to_vmem [thread:$0]  %s2040_s1, 256, %s31_s16, [#allocation6], %s1705_s27, %s1705_s27, %s1706_s28  }
  0x15   :  { %s1607_s7 = scalar_lea.hbm %s2039_s0, 4096 }
  0x16   :  { %p1608_p8 = scmp.ne.s32.totalorder %s2039_s0, %s1607_s7  ;;  %p1611_p9 = scmp.lt.u32.totalorder %s1607_s7, %s2039_s0 }
  0x18   :  { %p1613_p10 = pnand %p1611_p9, %p1608_p8 }
  0x1a   :  { %1616 = shalt.err (!%p1613_p10)
}
  0x1b   :  { %s1617_s12 = scalar_lea.vmem %s1735_s18, 4096  ;;  %p1622_p12 = scmp.lt.s32.totalorder %s1735_s18, %s1735_s18 }
  0x1c   :  { %p1618_p11 = scmp.ne.s32.totalorder %s1735_s18, %s1617_s12  ;;  %p1623_p13 = scmp.lt.s32.totalorder %s1617_s12, %s1617_s12 }
  0x1e   :  { %p1624_p0 = por %p1623_p13, %p1622_p12 }
  0x20   :  { %p1625_p1 = pnand %p1624_p0, %p1618_p11 }
  0x22   :  { %1628 = shalt.err (!%p1625_p1)
}
  0x23   :  { %24 = dma.hbm_to_vmem [thread:$0]  %s2039_s0, 4096, %s1735_s18, [#allocation3], %s1705_s27, %s1705_s27, %s1706_s28  }
  0x24   :  { %s1707_s14 = smov [#allocation7]   ;;  %s1708_s16 = smov [#allocation8]  }
  0x25   :  { %s43_s15 = sshll.u32 %s1707_s14, 4  ;;  %s53_s17 = sshll.u32 %s1708_s16, 4  ;;  %s44_s15 = int_to_ptr.vmem [resolvable:$true] %s43_s15  ;;  %s54_s17 = int_to_ptr.vmem [resolvable:$true] %s53_s17 }
  0x26   :  { %s1629_s21 = scalar_lea.hbm %s2041_s2, 16 }
  0x27   :  { %p1630_p2 = scmp.ne.s32.totalorder %s2041_s2, %s1629_s21  ;;  %p1633_p3 = scmp.lt.u32.totalorder %s1629_s21, %s2041_s2 }
  0x29   :  { %p1635_p4 = pnand %p1633_p3, %p1630_p2 }
  0x2b   :  { %1638 = shalt.err (!%p1635_p4)
}
  0x2c   :  { %s1639_s0 = scalar_lea.vmem %s44_s15, 16  ;;  %s1643_s18 = scalar_lea.vmem %s44_s15, 32 }
  0x2d   :  { %p1640_p5 = scmp.ne.s32.totalorder %s44_s15, %s1639_s0  ;;  %p1644_p6 = scmp.lt.s32.totalorder %s44_s15, %s44_s15 }
  0x2e   :  { %p1645_p7 = scmp.lt.s32.totalorder %s1643_s18, %s1639_s0 }
  0x30   :  { %p1646_p8 = por %p1645_p7, %p1644_p6 }
  0x32   :  { %p1647_p9 = pnand %p1646_p8, %p1640_p5 }
  0x34   :  { %1650 = shalt.err (!%p1647_p9)
}
  0x35   :  { %46 = dma.hbm_to_vmem [thread:$0]  %s2041_s2, 16, %s44_s15, [#allocation6]  }
  0x36   :  { %s1651_s6 = scalar_lea.hbm %s2042_s3, 16 }
  0x37   :  { %p1652_p10 = scmp.ne.s32.totalorder %s2042_s3, %s1651_s6  ;;  %p1655_p11 = scmp.lt.u32.totalorder %s1651_s6, %s2042_s3 }
  0x39   :  { %p1657_p12 = pnand %p1655_p11, %p1652_p10 }
  0x3b   :  { %1660 = shalt.err (!%p1657_p12)
}
  0x3c   :  { %s1661_s11 = scalar_lea.vmem %s54_s17, 16  ;;  %s1665_s12 = scalar_lea.vmem %s54_s17, 32 }
  0x3d   :  { %p1662_p13 = scmp.ne.s32.totalorder %s54_s17, %s1661_s11  ;;  %p1666_p0 = scmp.lt.s32.totalorder %s54_s17, %s54_s17 }
  0x3e   :  { %p1667_p1 = scmp.lt.s32.totalorder %s1665_s12, %s1661_s11 }
  0x40   :  { %p1668_p2 = por %p1667_p1, %p1666_p0 }
  0x42   :  { %p1669_p3 = pnand %p1668_p2, %p1662_p13 }
  0x44   :  { %1672 = shalt.err (!%p1669_p3)
}
  0x45   :  { %56 = dma.hbm_to_vmem [thread:$0]  %s2042_s3, 16, %s54_s17, [#allocation9]  }
  0x46   :  { %1695 = dma.done.wait [#allocation3], 4096  }
  0x47   :  { %1696 = vsyncadd [#allocation3], 4294963200 }
  0x48   :  { %1697 = dma.done.wait [#allocation6], 272  }
  0x49   :  { %1698 = vsyncadd [#allocation6], 4294967024 }
  0x4a   :  { %1699 = dma.done.wait [#allocation9], 16  }
  0x4b   :  { %1700 = vsyncadd [#allocation9], 4294967280  ;;  %v1551_v0 = vld [vmem:[#allocation5] sm:$0xff]   ;;  %v1552_v1 = vld [vmem:[#allocation5 + $0x8] sm:$0xff]   ;;  %vm310_vm0 = vcmask 261120   ;;  %vm1158_vm1 = vcmask 125952  }
  0x4c   :  { %1472 = vmatprep.subr.bf16.mxu0 %v1551_v0  ;;  %1540 = vmatprep.subr.bf16.mxu1 %v1551_v0  ;;  %v1553_v2 = vld [vmem:[#allocation2] sm:$0xff]   ;;  %v1555_v4 = vld [vmem:[#allocation2 + $0x8] sm:$0xff]   ;;  %v1557_v6 = vld [vmem:[#allocation2 + $0x10] sm:$0xff]   ;;  %s1709_s3 = smov [#allocation10]  }
  0x4d   :  { %1473 = vmatpush3.bf16.msra.mxu0 %v1551_v0  ;;  %1542 = vmatpush3.bf16.msra.mxu1 %v1551_v0  ;;  %v1554_v3 = vld [vmem:[#allocation2 + $0x80] sm:$0xff]   ;;  %v1556_v5 = vld [vmem:[#allocation2 + $0x88] sm:$0xff]   ;;  %v1558_v7 = vld [vmem:[#allocation2 + $0x90] sm:$0xff]   ;;  %s1228_s13 = sshll.u32 %s1709_s3, 4  ;;  %s1229_s13 = int_to_ptr.vmem [resolvable:$true] %s1228_s13 }
  0x4e   :  { %1474 = vmatprep.subr.bf16.mxu0 %v1552_v1  ;;  %1541 = vmatprep.subr.bf16.mxu1 %v1552_v1  ;;  %v1559_v8 = vld [vmem:[#allocation2 + $0x18] sm:$0xff]   ;;  %v1561_v10 = vld [vmem:[#allocation2 + $0x20] sm:$0xff]   ;;  %v1563_v12 = vld [vmem:[#allocation2 + $0x28] sm:$0xff]   ;;  %s1673_s14 = scalar_lea.vmem %s1229_s13, 4096  ;;  %p1678_p5 = scmp.lt.s32.totalorder %s1229_s13, %s1229_s13 }
  0x4f   :  { %1476 = vmatprep.mubr.msk.bf16.mxu0 %vm310_vm0, %v1553_v2  ;;  %1508 = vmatprep.mubr.msk.bf16.mxu1 %vm310_vm0, %v1554_v3  ;;  %v1560_v9 = vld [vmem:[#allocation2 + $0x98] sm:$0xff]   ;;  %v1562_v11 = vld [vmem:[#allocation2 + $0xa0] sm:$0xff]   ;;  %v1564_v13 = vld [vmem:[#allocation2 + $0xa8] sm:$0xff]   ;;  %p1674_p4 = scmp.ne.s32.totalorder %s1229_s13, %s1673_s14  ;;  %p1679_p6 = scmp.lt.s32.totalorder %s1673_s14, %s1673_s14 }
  0x50   :  { %v1565_v14 = vld [vmem:[#allocation2 + $0x30] sm:$0xff]   ;;  %v1567_v16 = vld [vmem:[#allocation2 + $0x38] sm:$0xff]   ;;  %v1569_v18 = vld [vmem:[#allocation2 + $0x40] sm:$0xff]  }
  0x51   :  { %1475 = vmatpush3.bf16.msra.mxu0 %v1552_v1  ;;  %1543 = vmatpush3.bf16.msra.mxu1 %v1552_v1  ;;  %v1566_v15 = vld [vmem:[#allocation2 + $0xb0] sm:$0xff]   ;;  %v1568_v17 = vld [vmem:[#allocation2 + $0xb8] sm:$0xff]   ;;  %v1570_v19 = vld [vmem:[#allocation2 + $0xc0] sm:$0xff]   ;;  %p1680_p7 = por %p1679_p6, %p1678_p5 }
  0x52   :  { %v1571_v20 = vld [vmem:[#allocation2 + $0x48] sm:$0xff]   ;;  %v1573_v22 = vld [vmem:[#allocation2 + $0x50] sm:$0xff]   ;;  %v1575_v24 = vld [vmem:[#allocation2 + $0x58] sm:$0xff]  }
  0x53   :  { %v1572_v21 = vld [vmem:[#allocation2 + $0xc8] sm:$0xff]   ;;  %v1574_v23 = vld [vmem:[#allocation2 + $0xd0] sm:$0xff]   ;;  %v1576_v25 = vld [vmem:[#allocation2 + $0xd8] sm:$0xff]   ;;  %p1681_p8 = pnand %p1680_p7, %p1674_p4 }
  0x54   :  { %1477 = vmatmul.mubr.msk.bf16.vlgmr.msra.gmra.mrb[0].mxu0 %vm310_vm0, %v1555_v4  ;;  %1509 = vmatmul.mubr.msk.bf16.vlgmr.msra.gmra.mrb[0].mxu1 %vm310_vm0, %v1556_v5  ;;  %v1577_v26 = vld [vmem:[#allocation2 + $0x60] sm:$0xff]   ;;  %v1579_v28 = vld [vmem:[#allocation2 + $0x68] sm:$0xff]   ;;  %v1581_v30 = vld [vmem:[#allocation2 + $0x70] sm:$0xff]  }
  0x55   :  { %1480 = vmatprep.mubr.msk.bf16.mxu0 %vm310_vm0, %v1557_v6  ;;  %1512 = vmatprep.mubr.msk.bf16.mxu1 %vm310_vm0, %v1558_v7  ;;  %v1578_v27 = vld [vmem:[#allocation2 + $0xe0] sm:$0xff]   ;;  %v1580_v29 = vld [vmem:[#allocation2 + $0xe8] sm:$0xff]   ;;  %v1582_v31 = vld [vmem:[#allocation2 + $0xf0] sm:$0xff]  }
  0x56   :  { %v1583_v32 = vld [vmem:[#allocation2 + $0x78] sm:$0xff]   ;;  %v1828_v34 = vld [vmem:[#allocation7] ss:$0 sm:$0xff]  ;;  %v1830_v36 = vld [vmem:[#allocation8] ss:$0 sm:$0xff] }
  0x57   :  { %v1584_v33 = vld [vmem:[#allocation2 + $0xf8] sm:$0xff]  }
  0x5c   :  { %1481 = vmatmul.mubr.msk.bf16.gmra.mrb[4].mxu0 %vm310_vm0, %v1559_v8  ;;  %1513 = vmatmul.mubr.msk.bf16.gmra.mrb[4].mxu1 %vm310_vm0, %v1560_v9 }
  0x5d   :  { %1484 = vmatprep.mubr.msk.bf16.mxu0 %vm310_vm0, %v1561_v10  ;;  %1516 = vmatprep.mubr.msk.bf16.mxu1 %vm310_vm0, %v1562_v11 }
  0x64   :  { %1485 = vmatmul.mubr.msk.bf16.gmra.mrb[8].mxu0 %vm310_vm0, %v1563_v12  ;;  %1517 = vmatmul.mubr.msk.bf16.gmra.mrb[8].mxu1 %vm310_vm0, %v1564_v13 }
  0x65   :  { %1488 = vmatprep.mubr.msk.bf16.mxu0 %vm310_vm0, %v1565_v14  ;;  %1520 = vmatprep.mubr.msk.bf16.mxu1 %vm310_vm0, %v1566_v15 }
  0x6c   :  { %1489 = vmatmul.mubr.msk.bf16.gmra.mrb[12].mxu0 %vm310_vm0, %v1567_v16  ;;  %1521 = vmatmul.mubr.msk.bf16.gmra.mrb[12].mxu1 %vm310_vm0, %v1568_v17 }
  0x6d   :  { %1492 = vmatprep.mubr.msk.bf16.mxu0 %vm310_vm0, %v1569_v18  ;;  %1524 = vmatprep.mubr.msk.bf16.mxu1 %vm310_vm0, %v1570_v19 }
  0x74   :  { %1493 = vmatmul.mubr.msk.bf16.gmra.mrb[16].mxu0 %vm310_vm0, %v1571_v20  ;;  %1525 = vmatmul.mubr.msk.bf16.gmra.mrb[16].mxu1 %vm310_vm0, %v1572_v21 }
  0x75   :  { %1496 = vmatprep.mubr.msk.bf16.mxu0 %vm310_vm0, %v1573_v22  ;;  %1528 = vmatprep.mubr.msk.bf16.mxu1 %vm310_vm0, %v1574_v23 }
  0x7c   :  { %1497 = vmatmul.mubr.msk.bf16.gmra.mrb[20].mxu0 %vm310_vm0, %v1575_v24  ;;  %1529 = vmatmul.mubr.msk.bf16.gmra.mrb[20].mxu1 %vm310_vm0, %v1576_v25 }
  0x7d   :  { %1500 = vmatprep.mubr.msk.bf16.mxu0 %vm310_vm0, %v1577_v26  ;;  %1532 = vmatprep.mubr.msk.bf16.mxu1 %vm310_vm0, %v1578_v27 }
  0x84   :  { %1501 = vmatmul.mubr.msk.bf16.gmra.mrb[24].mxu0 %vm310_vm0, %v1579_v28  ;;  %1533 = vmatmul.mubr.msk.bf16.gmra.mrb[24].mxu1 %vm310_vm0, %v1580_v29 }
  0x85   :  { %1504 = vmatprep.mubr.msk.bf16.mxu0 %vm310_vm0, %v1581_v30  ;;  %1536 = vmatprep.mubr.msk.bf16.mxu1 %vm310_vm0, %v1582_v31 }
  0x8c   :  { %1505 = vmatmul.mubr.msk.bf16.gmra.mrb[28].mxu0 %vm310_vm0, %v1583_v32  ;;  %1537 = vmatmul.mubr.msk.bf16.gmra.mrb[28].mxu1 %vm310_vm0, %v1584_v33 }
 0x127   :  { %v1478_v35 = vpop.f32.mrb[0].mxu0  ;;  %v1510_v37 = vpop.f32.mrb[0].mxu1 }
 0x128   :  { %v705_v38 = vmul.f32 %v1478_v35, %v1828_v34  ;;  %v737_v39 = vmul.f32 %v1510_v37, %v1828_v34  ;;  %v441_v40 = vpop.f32.mrb[1].mxu0  ;;  %v569_v41 = vpop.f32.mrb[1].mxu1 }
 0x129   :  { %v703_v42 = vmul.f32 %v1828_v34, %v441_v40  ;;  %v735_v43 = vmul.f32 %v1828_v34, %v569_v41  ;;  %v1479_v44 = vpop.f32.mrb[2].mxu0  ;;  %v1511_v45 = vpop.f32.mrb[2].mxu1 }
 0x12a   :  { %v776_v46 = vadd.f32 %v1830_v36, %v705_v38  ;;  %v808_v47 = vadd.f32 %v1830_v36, %v737_v39  ;;  %v706_v48 = vmul.f32 %v1479_v44, %v1828_v34  ;;  %v738_v49 = vmul.f32 %v1511_v45, %v1828_v34  ;;  %v444_v50 = vpop.f32.mrb[3].mxu0  ;;  %v572_v51 = vpop.f32.mrb[3].mxu1 }
 0x12b   :  { %v774_v52 = vadd.f32 %v1830_v36, %v703_v42  ;;  %v806_v53 = vadd.f32 %v1830_v36, %v735_v43  ;;  %v704_v54 = vmul.f32 %v1828_v34, %v444_v50  ;;  %v736_v55 = vmul.f32 %v1828_v34, %v572_v51 }
 0x12c   :  { %v840_v56 = vmax.f32 %v776_v46, 0.0  ;;  %v872_v57 = vmax.f32 %v808_v47, 0.0  ;;  %v777_v58 = vadd.f32 %v1830_v36, %v706_v48  ;;  %v809_v59 = vadd.f32 %v1830_v36, %v738_v49 }
 0x12d   :  { %v838_v60 = vmax.f32 %v774_v52, 0.0  ;;  %v870_v61 = vmax.f32 %v806_v53, 0.0  ;;  %v775_v62 = vadd.f32 %v1830_v36, %v704_v54  ;;  %v807_v63 = vadd.f32 %v1830_v36, %v736_v55 }
 0x12e   :  { %v1376_v0 = vpack.c.bf16 %v840_v56, %v840_v56  ;;  %v1408_v1 = vpack.c.bf16 %v872_v57, %v872_v57  ;;  %v841_v2 = vmax.f32 %v777_v58, 0.0  ;;  %v873_v3 = vmax.f32 %v809_v59, 0.0 }
 0x12f   :  { %v1374_v4 = vpack.c.bf16 %v838_v60, %v838_v60  ;;  %v1406_v5 = vpack.c.bf16 %v870_v61, %v870_v61  ;;  %v839_v6 = vmax.f32 %v775_v62, 0.0  ;;  %v871_v7 = vmax.f32 %v807_v63, 0.0  ;;  %v1482_v8 = vpop.f32.mrb[4].mxu0  ;;  %v1514_v9 = vpop.f32.mrb[4].mxu1 }
 0x130   :  { %1161 = vst.msk [vmem:[#allocation10 + $0x8] sm:$0xf] %vm1158_vm1, %v1376_v0  ;;  %1193 = vst.msk [vmem:[#allocation10 + $0x88] sm:$0xf] %vm1158_vm1, %v1408_v1  ;;  %v1377_v10 = vpack.c.bf16 %v841_v2, %v841_v2  ;;  %v1409_v11 = vpack.c.bf16 %v873_v3, %v873_v3  ;;  %v709_v12 = vmul.f32 %v1482_v8, %v1828_v34  ;;  %v457_v14 = vpop.f32.mrb[5].mxu0  ;;  %v585_v15 = vpop.f32.mrb[5].mxu1 }
 0x131   :  { %v741_v13 = vmul.f32 %v1514_v9, %v1828_v34  ;;  %1159 = vst.msk [vmem:[#allocation10] sm:$0xf] %vm1158_vm1, %v1374_v4  ;;  %1191 = vst.msk [vmem:[#allocation10 + $0x80] sm:$0xf] %vm1158_vm1, %v1406_v5  ;;  %v1375_v16 = vpack.c.bf16 %v839_v6, %v839_v6  ;;  %v1407_v17 = vpack.c.bf16 %v871_v7, %v871_v7  ;;  %v1483_v20 = vpop.f32.mrb[6].mxu0  ;;  %v1515_v21 = vpop.f32.mrb[6].mxu1 }
 0x132   :  { %v707_v18 = vmul.f32 %v1828_v34, %v457_v14  ;;  %v739_v19 = vmul.f32 %v1828_v34, %v585_v15  ;;  %1162 = vst.msk [vmem:[#allocation10 + $0xc] sm:$0xf] %vm1158_vm1, %v1377_v10  ;;  %1194 = vst.msk [vmem:[#allocation10 + $0x8c] sm:$0xf] %vm1158_vm1, %v1409_v11  ;;  %v780_v22 = vadd.f32 %v1830_v36, %v709_v12  ;;  %v460_v26 = vpop.f32.mrb[7].mxu0  ;;  %v588_v27 = vpop.f32.mrb[7].mxu1 }
 0x133   :  { %v812_v23 = vadd.f32 %v1830_v36, %v741_v13  ;;  %v710_v24 = vmul.f32 %v1483_v20, %v1828_v34  ;;  %v742_v25 = vmul.f32 %v1515_v21, %v1828_v34  ;;  %1160 = vst.msk [vmem:[#allocation10 + $0x4] sm:$0xf] %vm1158_vm1, %v1375_v16  ;;  %1192 = vst.msk [vmem:[#allocation10 + $0x84] sm:$0xf] %vm1158_vm1, %v1407_v17 }
 0x134   :  { %v778_v28 = vadd.f32 %v1830_v36, %v707_v18  ;;  %v810_v29 = vadd.f32 %v1830_v36, %v739_v19  ;;  %v708_v30 = vmul.f32 %v1828_v34, %v460_v26  ;;  %v740_v31 = vmul.f32 %v1828_v34, %v588_v27 }
 0x135   :  { %v844_v32 = vmax.f32 %v780_v22, 0.0  ;;  %v876_v33 = vmax.f32 %v812_v23, 0.0  ;;  %v781_v35 = vadd.f32 %v1830_v36, %v710_v24  ;;  %v813_v37 = vadd.f32 %v1830_v36, %v742_v25 }
 0x136   :  { %v842_v38 = vmax.f32 %v778_v28, 0.0  ;;  %v874_v39 = vmax.f32 %v810_v29, 0.0  ;;  %v779_v40 = vadd.f32 %v1830_v36, %v708_v30  ;;  %v811_v41 = vadd.f32 %v1830_v36, %v740_v31 }
 0x137   :  { %v1380_v42 = vpack.c.bf16 %v844_v32, %v844_v32  ;;  %v1412_v43 = vpack.c.bf16 %v876_v33, %v876_v33  ;;  %v845_v44 = vmax.f32 %v781_v35, 0.0  ;;  %v877_v45 = vmax.f32 %v813_v37, 0.0  ;;  %v1486_v50 = vpop.f32.mrb[8].mxu0  ;;  %v1518_v51 = vpop.f32.mrb[8].mxu1 }
 0x138   :  { %v1378_v46 = vpack.c.bf16 %v842_v38, %v842_v38  ;;  %v1410_v47 = vpack.c.bf16 %v874_v39, %v874_v39  ;;  %v843_v48 = vmax.f32 %v779_v40, 0.0  ;;  %v875_v49 = vmax.f32 %v811_v41, 0.0  ;;  %v473_v56 = vpop.f32.mrb[9].mxu0  ;;  %v601_v57 = vpop.f32.mrb[9].mxu1 }
 0x139   :  { %1165 = vst.msk [vmem:[#allocation10 + $0x18] sm:$0xf] %vm1158_vm1, %v1380_v42  ;;  %1197 = vst.msk [vmem:[#allocation10 + $0x98] sm:$0xf] %vm1158_vm1, %v1412_v43  ;;  %v1381_v52 = vpack.c.bf16 %v845_v44, %v845_v44  ;;  %v1413_v53 = vpack.c.bf16 %v877_v45, %v877_v45  ;;  %v713_v54 = vmul.f32 %v1486_v50, %v1828_v34  ;;  %v1487_v62 = vpop.f32.mrb[10].mxu0  ;;  %v1519_v63 = vpop.f32.mrb[10].mxu1 }
 0x13a   :  { %v745_v55 = vmul.f32 %v1518_v51, %v1828_v34  ;;  %1163 = vst.msk [vmem:[#allocation10 + $0x10] sm:$0xf] %vm1158_vm1, %v1378_v46  ;;  %1195 = vst.msk [vmem:[#allocation10 + $0x90] sm:$0xf] %vm1158_vm1, %v1410_v47  ;;  %v1379_v58 = vpack.c.bf16 %v843_v48, %v843_v48  ;;  %v1411_v59 = vpack.c.bf16 %v875_v49, %v875_v49  ;;  %v476_v4 = vpop.f32.mrb[11].mxu0  ;;  %v604_v5 = vpop.f32.mrb[11].mxu1 }
 0x13b   :  { %v711_v60 = vmul.f32 %v1828_v34, %v473_v56  ;;  %v743_v61 = vmul.f32 %v1828_v34, %v601_v57  ;;  %1166 = vst.msk [vmem:[#allocation10 + $0x1c] sm:$0xf] %vm1158_vm1, %v1381_v52  ;;  %1198 = vst.msk [vmem:[#allocation10 + $0x9c] sm:$0xf] %vm1158_vm1, %v1413_v53  ;;  %v784_v0 = vadd.f32 %v1830_v36, %v713_v54 }
 0x13c   :  { %v816_v1 = vadd.f32 %v1830_v36, %v745_v55  ;;  %v714_v2 = vmul.f32 %v1487_v62, %v1828_v34  ;;  %v746_v3 = vmul.f32 %v1519_v63, %v1828_v34  ;;  %1164 = vst.msk [vmem:[#allocation10 + $0x14] sm:$0xf] %vm1158_vm1, %v1379_v58  ;;  %1196 = vst.msk [vmem:[#allocation10 + $0x94] sm:$0xf] %vm1158_vm1, %v1411_v59 }
 0x13d   :  { %v782_v6 = vadd.f32 %v1830_v36, %v711_v60  ;;  %v814_v7 = vadd.f32 %v1830_v36, %v743_v61  ;;  %v712_v8 = vmul.f32 %v1828_v34, %v476_v4  ;;  %v744_v9 = vmul.f32 %v1828_v34, %v604_v5 }
 0x13e   :  { %v848_v10 = vmax.f32 %v784_v0, 0.0  ;;  %v880_v11 = vmax.f32 %v816_v1, 0.0  ;;  %v785_v12 = vadd.f32 %v1830_v36, %v714_v2  ;;  %v817_v13 = vadd.f32 %v1830_v36, %v746_v3 }
 0x13f   :  { %v846_v14 = vmax.f32 %v782_v6, 0.0  ;;  %v878_v15 = vmax.f32 %v814_v7, 0.0  ;;  %v783_v16 = vadd.f32 %v1830_v36, %v712_v8  ;;  %v815_v17 = vadd.f32 %v1830_v36, %v744_v9  ;;  %v1490_v26 = vpop.f32.mrb[12].mxu0  ;;  %v1522_v27 = vpop.f32.mrb[12].mxu1 }
 0x140   :  { %v1384_v18 = vpack.c.bf16 %v848_v10, %v848_v10  ;;  %v1416_v19 = vpack.c.bf16 %v880_v11, %v880_v11  ;;  %v849_v20 = vmax.f32 %v785_v12, 0.0  ;;  %v881_v21 = vmax.f32 %v817_v13, 0.0  ;;  %v489_v32 = vpop.f32.mrb[13].mxu0  ;;  %v617_v33 = vpop.f32.mrb[13].mxu1 }
 0x141   :  { %v1382_v22 = vpack.c.bf16 %v846_v14, %v846_v14  ;;  %v1414_v23 = vpack.c.bf16 %v878_v15, %v878_v15  ;;  %v847_v24 = vmax.f32 %v783_v16, 0.0  ;;  %v879_v25 = vmax.f32 %v815_v17, 0.0  ;;  %v1491_v40 = vpop.f32.mrb[14].mxu0  ;;  %v1523_v41 = vpop.f32.mrb[14].mxu1 }
 0x142   :  { %1169 = vst.msk [vmem:[#allocation10 + $0x28] sm:$0xf] %vm1158_vm1, %v1384_v18  ;;  %1201 = vst.msk [vmem:[#allocation10 + $0xa8] sm:$0xf] %vm1158_vm1, %v1416_v19  ;;  %v1385_v28 = vpack.c.bf16 %v849_v20, %v849_v20  ;;  %v1417_v29 = vpack.c.bf16 %v881_v21, %v881_v21  ;;  %v717_v30 = vmul.f32 %v1490_v26, %v1828_v34  ;;  %v492_v46 = vpop.f32.mrb[15].mxu0  ;;  %v620_v47 = vpop.f32.mrb[15].mxu1 }
 0x143   :  { %v749_v31 = vmul.f32 %v1522_v27, %v1828_v34  ;;  %1167 = vst.msk [vmem:[#allocation10 + $0x20] sm:$0xf] %vm1158_vm1, %v1382_v22  ;;  %1199 = vst.msk [vmem:[#allocation10 + $0xa0] sm:$0xf] %vm1158_vm1, %v1414_v23  ;;  %v1383_v35 = vpack.c.bf16 %v847_v24, %v847_v24  ;;  %v1415_v37 = vpack.c.bf16 %v879_v25, %v879_v25 }
 0x144   :  { %v715_v38 = vmul.f32 %v1828_v34, %v489_v32  ;;  %v747_v39 = vmul.f32 %v1828_v34, %v617_v33  ;;  %1170 = vst.msk [vmem:[#allocation10 + $0x2c] sm:$0xf] %vm1158_vm1, %v1385_v28  ;;  %1202 = vst.msk [vmem:[#allocation10 + $0xac] sm:$0xf] %vm1158_vm1, %v1417_v29  ;;  %v788_v42 = vadd.f32 %v1830_v36, %v717_v30 }
 0x145   :  { %v820_v43 = vadd.f32 %v1830_v36, %v749_v31  ;;  %v718_v44 = vmul.f32 %v1491_v40, %v1828_v34  ;;  %v750_v45 = vmul.f32 %v1523_v41, %v1828_v34  ;;  %1168 = vst.msk [vmem:[#allocation10 + $0x24] sm:$0xf] %vm1158_vm1, %v1383_v35  ;;  %1200 = vst.msk [vmem:[#allocation10 + $0xa4] sm:$0xf] %vm1158_vm1, %v1415_v37 }
 0x146   :  { %v786_v48 = vadd.f32 %v1830_v36, %v715_v38  ;;  %v818_v49 = vadd.f32 %v1830_v36, %v747_v39  ;;  %v716_v50 = vmul.f32 %v1828_v34, %v492_v46  ;;  %v748_v51 = vmul.f32 %v1828_v34, %v620_v47 }
 0x147   :  { %v852_v52 = vmax.f32 %v788_v42, 0.0  ;;  %v884_v53 = vmax.f32 %v820_v43, 0.0  ;;  %v789_v54 = vadd.f32 %v1830_v36, %v718_v44  ;;  %v821_v55 = vadd.f32 %v1830_v36, %v750_v45  ;;  %v1494_v4 = vpop.f32.mrb[16].mxu0  ;;  %v1526_v5 = vpop.f32.mrb[16].mxu1 }
 0x148   :  { %v850_v56 = vmax.f32 %v786_v48, 0.0  ;;  %v882_v57 = vmax.f32 %v818_v49, 0.0  ;;  %v787_v58 = vadd.f32 %v1830_v36, %v716_v50  ;;  %v819_v59 = vadd.f32 %v1830_v36, %v748_v51  ;;  %v505_v10 = vpop.f32.mrb[17].mxu0  ;;  %v633_v11 = vpop.f32.mrb[17].mxu1 }
 0x149   :  { %v1388_v60 = vpack.c.bf16 %v852_v52, %v852_v52  ;;  %v1420_v61 = vpack.c.bf16 %v884_v53, %v884_v53  ;;  %v853_v62 = vmax.f32 %v789_v54, 0.0  ;;  %v885_v63 = vmax.f32 %v821_v55, 0.0  ;;  %v1495_v16 = vpop.f32.mrb[18].mxu0  ;;  %v1527_v17 = vpop.f32.mrb[18].mxu1 }
 0x14a   :  { %v1386_v0 = vpack.c.bf16 %v850_v56, %v850_v56  ;;  %v1418_v1 = vpack.c.bf16 %v882_v57, %v882_v57  ;;  %v851_v2 = vmax.f32 %v787_v58, 0.0  ;;  %v883_v3 = vmax.f32 %v819_v59, 0.0  ;;  %v508_v22 = vpop.f32.mrb[19].mxu0  ;;  %v636_v23 = vpop.f32.mrb[19].mxu1 }
 0x14b   :  { %1173 = vst.msk [vmem:[#allocation10 + $0x38] sm:$0xf] %vm1158_vm1, %v1388_v60  ;;  %1205 = vst.msk [vmem:[#allocation10 + $0xb8] sm:$0xf] %vm1158_vm1, %v1420_v61  ;;  %v1389_v6 = vpack.c.bf16 %v853_v62, %v853_v62  ;;  %v1421_v7 = vpack.c.bf16 %v885_v63, %v885_v63  ;;  %v721_v8 = vmul.f32 %v1494_v4, %v1828_v34 }
 0x14c   :  { %v753_v9 = vmul.f32 %v1526_v5, %v1828_v34  ;;  %1171 = vst.msk [vmem:[#allocation10 + $0x30] sm:$0xf] %vm1158_vm1, %v1386_v0  ;;  %1203 = vst.msk [vmem:[#allocation10 + $0xb0] sm:$0xf] %vm1158_vm1, %v1418_v1  ;;  %v1387_v12 = vpack.c.bf16 %v851_v2, %v851_v2  ;;  %v1419_v13 = vpack.c.bf16 %v883_v3, %v883_v3 }
 0x14d   :  { %v719_v14 = vmul.f32 %v1828_v34, %v505_v10  ;;  %v751_v15 = vmul.f32 %v1828_v34, %v633_v11  ;;  %1174 = vst.msk [vmem:[#allocation10 + $0x3c] sm:$0xf] %vm1158_vm1, %v1389_v6  ;;  %1206 = vst.msk [vmem:[#allocation10 + $0xbc] sm:$0xf] %vm1158_vm1, %v1421_v7  ;;  %v792_v18 = vadd.f32 %v1830_v36, %v721_v8 }
 0x14e   :  { %v824_v19 = vadd.f32 %v1830_v36, %v753_v9  ;;  %v722_v20 = vmul.f32 %v1495_v16, %v1828_v34  ;;  %v754_v21 = vmul.f32 %v1527_v17, %v1828_v34  ;;  %1172 = vst.msk [vmem:[#allocation10 + $0x34] sm:$0xf] %vm1158_vm1, %v1387_v12  ;;  %1204 = vst.msk [vmem:[#allocation10 + $0xb4] sm:$0xf] %vm1158_vm1, %v1419_v13 }
 0x14f   :  { %v790_v24 = vadd.f32 %v1830_v36, %v719_v14  ;;  %v822_v25 = vadd.f32 %v1830_v36, %v751_v15  ;;  %v720_v26 = vmul.f32 %v1828_v34, %v508_v22  ;;  %v752_v27 = vmul.f32 %v1828_v34, %v636_v23  ;;  %v1498_v46 = vpop.f32.mrb[20].mxu0  ;;  %v1530_v47 = vpop.f32.mrb[20].mxu1 }
 0x150   :  { %v856_v28 = vmax.f32 %v792_v18, 0.0  ;;  %v888_v29 = vmax.f32 %v824_v19, 0.0  ;;  %v793_v30 = vadd.f32 %v1830_v36, %v722_v20  ;;  %v825_v31 = vadd.f32 %v1830_v36, %v754_v21  ;;  %v521_v52 = vpop.f32.mrb[21].mxu0  ;;  %v649_v53 = vpop.f32.mrb[21].mxu1 }
 0x151   :  { %v854_v32 = vmax.f32 %v790_v24, 0.0  ;;  %v886_v33 = vmax.f32 %v822_v25, 0.0  ;;  %v791_v35 = vadd.f32 %v1830_v36, %v720_v26  ;;  %v823_v37 = vadd.f32 %v1830_v36, %v752_v27  ;;  %v1499_v58 = vpop.f32.mrb[22].mxu0  ;;  %v1531_v59 = vpop.f32.mrb[22].mxu1 }
 0x152   :  { %v1392_v38 = vpack.c.bf16 %v856_v28, %v856_v28  ;;  %v1424_v39 = vpack.c.bf16 %v888_v29, %v888_v29  ;;  %v857_v40 = vmax.f32 %v793_v30, 0.0  ;;  %v889_v41 = vmax.f32 %v825_v31, 0.0  ;;  %v524_v0 = vpop.f32.mrb[23].mxu0  ;;  %v652_v1 = vpop.f32.mrb[23].mxu1 }
 0x153   :  { %v1390_v42 = vpack.c.bf16 %v854_v32, %v854_v32  ;;  %v1422_v43 = vpack.c.bf16 %v886_v33, %v886_v33  ;;  %v855_v44 = vmax.f32 %v791_v35, 0.0  ;;  %v887_v45 = vmax.f32 %v823_v37, 0.0 }
 0x154   :  { %1177 = vst.msk [vmem:[#allocation10 + $0x48] sm:$0xf] %vm1158_vm1, %v1392_v38  ;;  %1209 = vst.msk [vmem:[#allocation10 + $0xc8] sm:$0xf] %vm1158_vm1, %v1424_v39  ;;  %v1393_v48 = vpack.c.bf16 %v857_v40, %v857_v40  ;;  %v1425_v49 = vpack.c.bf16 %v889_v41, %v889_v41  ;;  %v725_v50 = vmul.f32 %v1498_v46, %v1828_v34 }
 0x155   :  { %v757_v51 = vmul.f32 %v1530_v47, %v1828_v34  ;;  %1175 = vst.msk [vmem:[#allocation10 + $0x40] sm:$0xf] %vm1158_vm1, %v1390_v42  ;;  %1207 = vst.msk [vmem:[#allocation10 + $0xc0] sm:$0xf] %vm1158_vm1, %v1422_v43  ;;  %v1391_v54 = vpack.c.bf16 %v855_v44, %v855_v44  ;;  %v1423_v55 = vpack.c.bf16 %v887_v45, %v887_v45 }
 0x156   :  { %v723_v56 = vmul.f32 %v1828_v34, %v521_v52  ;;  %v755_v57 = vmul.f32 %v1828_v34, %v649_v53  ;;  %1178 = vst.msk [vmem:[#allocation10 + $0x4c] sm:$0xf] %vm1158_vm1, %v1393_v48  ;;  %1210 = vst.msk [vmem:[#allocation10 + $0xcc] sm:$0xf] %vm1158_vm1, %v1425_v49  ;;  %v796_v60 = vadd.f32 %v1830_v36, %v725_v50 }
 0x157   :  { %v828_v61 = vadd.f32 %v1830_v36, %v757_v51  ;;  %v726_v62 = vmul.f32 %v1499_v58, %v1828_v34  ;;  %v758_v63 = vmul.f32 %v1531_v59, %v1828_v34  ;;  %1176 = vst.msk [vmem:[#allocation10 + $0x44] sm:$0xf] %vm1158_vm1, %v1391_v54  ;;  %1208 = vst.msk [vmem:[#allocation10 + $0xc4] sm:$0xf] %vm1158_vm1, %v1423_v55  ;;  %v1502_v22 = vpop.f32.mrb[24].mxu0  ;;  %v1534_v23 = vpop.f32.mrb[24].mxu1 }
 0x158   :  { %v794_v2 = vadd.f32 %v1830_v36, %v723_v56  ;;  %v826_v3 = vadd.f32 %v1830_v36, %v755_v57  ;;  %v724_v4 = vmul.f32 %v1828_v34, %v524_v0  ;;  %v756_v5 = vmul.f32 %v1828_v34, %v652_v1  ;;  %v537_v28 = vpop.f32.mrb[25].mxu0  ;;  %v665_v29 = vpop.f32.mrb[25].mxu1 }
 0x159   :  { %v860_v6 = vmax.f32 %v796_v60, 0.0  ;;  %v892_v7 = vmax.f32 %v828_v61, 0.0  ;;  %v797_v8 = vadd.f32 %v1830_v36, %v726_v62  ;;  %v829_v9 = vadd.f32 %v1830_v36, %v758_v63  ;;  %v1503_v35 = vpop.f32.mrb[26].mxu0  ;;  %v1535_v37 = vpop.f32.mrb[26].mxu1 }
 0x15a   :  { %v858_v10 = vmax.f32 %v794_v2, 0.0  ;;  %v890_v11 = vmax.f32 %v826_v3, 0.0  ;;  %v795_v12 = vadd.f32 %v1830_v36, %v724_v4  ;;  %v827_v13 = vadd.f32 %v1830_v36, %v756_v5  ;;  %v540_v42 = vpop.f32.mrb[27].mxu0  ;;  %v668_v43 = vpop.f32.mrb[27].mxu1 }
 0x15b   :  { %v1396_v14 = vpack.c.bf16 %v860_v6, %v860_v6  ;;  %v1428_v15 = vpack.c.bf16 %v892_v7, %v892_v7  ;;  %v861_v16 = vmax.f32 %v797_v8, 0.0  ;;  %v893_v17 = vmax.f32 %v829_v9, 0.0 }
 0x15c   :  { %v1394_v18 = vpack.c.bf16 %v858_v10, %v858_v10  ;;  %v1426_v19 = vpack.c.bf16 %v890_v11, %v890_v11  ;;  %v859_v20 = vmax.f32 %v795_v12, 0.0  ;;  %v891_v21 = vmax.f32 %v827_v13, 0.0 }
 0x15d   :  { %1181 = vst.msk [vmem:[#allocation10 + $0x58] sm:$0xf] %vm1158_vm1, %v1396_v14  ;;  %1213 = vst.msk [vmem:[#allocation10 + $0xd8] sm:$0xf] %vm1158_vm1, %v1428_v15  ;;  %v1397_v24 = vpack.c.bf16 %v861_v16, %v861_v16  ;;  %v1429_v25 = vpack.c.bf16 %v893_v17, %v893_v17  ;;  %v729_v26 = vmul.f32 %v1502_v22, %v1828_v34 }
 0x15e   :  { %v761_v27 = vmul.f32 %v1534_v23, %v1828_v34  ;;  %1179 = vst.msk [vmem:[#allocation10 + $0x50] sm:$0xf] %vm1158_vm1, %v1394_v18  ;;  %1211 = vst.msk [vmem:[#allocation10 + $0xd0] sm:$0xf] %vm1158_vm1, %v1426_v19  ;;  %v1395_v30 = vpack.c.bf16 %v859_v20, %v859_v20  ;;  %v1427_v31 = vpack.c.bf16 %v891_v21, %v891_v21 }
 0x15f   :  { %v727_v32 = vmul.f32 %v1828_v34, %v537_v28  ;;  %v759_v33 = vmul.f32 %v1828_v34, %v665_v29  ;;  %1182 = vst.msk [vmem:[#allocation10 + $0x5c] sm:$0xf] %vm1158_vm1, %v1397_v24  ;;  %1214 = vst.msk [vmem:[#allocation10 + $0xdc] sm:$0xf] %vm1158_vm1, %v1429_v25  ;;  %v800_v38 = vadd.f32 %v1830_v36, %v729_v26  ;;  %v1506_v0 = vpop.f32.mrb[28].mxu0  ;;  %v1538_v1 = vpop.f32.mrb[28].mxu1 }
 0x160   :  { %v832_v39 = vadd.f32 %v1830_v36, %v761_v27  ;;  %v730_v40 = vmul.f32 %v1503_v35, %v1828_v34  ;;  %v762_v41 = vmul.f32 %v1535_v37, %v1828_v34  ;;  %1180 = vst.msk [vmem:[#allocation10 + $0x54] sm:$0xf] %vm1158_vm1, %v1395_v30  ;;  %1212 = vst.msk [vmem:[#allocation10 + $0xd4] sm:$0xf] %vm1158_vm1, %v1427_v31  ;;  %v553_v6 = vpop.f32.mrb[29].mxu0  ;;  %v681_v7 = vpop.f32.mrb[29].mxu1 }
 0x161   :  { %v798_v44 = vadd.f32 %v1830_v36, %v727_v32  ;;  %v830_v45 = vadd.f32 %v1830_v36, %v759_v33  ;;  %v728_v46 = vmul.f32 %v1828_v34, %v540_v42  ;;  %v760_v47 = vmul.f32 %v1828_v34, %v668_v43  ;;  %v1507_v12 = vpop.f32.mrb[30].mxu0  ;;  %v1539_v13 = vpop.f32.mrb[30].mxu1 }
 0x162   :  { %v864_v48 = vmax.f32 %v800_v38, 0.0  ;;  %v896_v49 = vmax.f32 %v832_v39, 0.0  ;;  %v801_v50 = vadd.f32 %v1830_v36, %v730_v40  ;;  %v833_v51 = vadd.f32 %v1830_v36, %v762_v41  ;;  %v556_v18 = vpop.f32.mrb[31].mxu0  ;;  %v684_v19 = vpop.f32.mrb[31].mxu1 }
 0x163   :  { %v862_v52 = vmax.f32 %v798_v44, 0.0  ;;  %v894_v53 = vmax.f32 %v830_v45, 0.0  ;;  %v799_v54 = vadd.f32 %v1830_v36, %v728_v46  ;;  %v831_v55 = vadd.f32 %v1830_v36, %v760_v47 }
 0x164   :  { %v1400_v56 = vpack.c.bf16 %v864_v48, %v864_v48  ;;  %v1432_v57 = vpack.c.bf16 %v896_v49, %v896_v49  ;;  %v865_v58 = vmax.f32 %v801_v50, 0.0  ;;  %v897_v59 = vmax.f32 %v833_v51, 0.0 }
 0x165   :  { %v1398_v60 = vpack.c.bf16 %v862_v52, %v862_v52  ;;  %v1430_v61 = vpack.c.bf16 %v894_v53, %v894_v53  ;;  %v863_v62 = vmax.f32 %v799_v54, 0.0  ;;  %v895_v63 = vmax.f32 %v831_v55, 0.0 }
 0x166   :  { %1185 = vst.msk [vmem:[#allocation10 + $0x68] sm:$0xf] %vm1158_vm1, %v1400_v56  ;;  %1217 = vst.msk [vmem:[#allocation10 + $0xe8] sm:$0xf] %vm1158_vm1, %v1432_v57  ;;  %v1401_v2 = vpack.c.bf16 %v865_v58, %v865_v58  ;;  %v1433_v3 = vpack.c.bf16 %v897_v59, %v897_v59  ;;  %v733_v4 = vmul.f32 %v1506_v0, %v1828_v34 }
 0x167   :  { %v765_v5 = vmul.f32 %v1538_v1, %v1828_v34  ;;  %1183 = vst.msk [vmem:[#allocation10 + $0x60] sm:$0xf] %vm1158_vm1, %v1398_v60  ;;  %1215 = vst.msk [vmem:[#allocation10 + $0xe0] sm:$0xf] %vm1158_vm1, %v1430_v61  ;;  %v1399_v8 = vpack.c.bf16 %v863_v62, %v863_v62  ;;  %v1431_v9 = vpack.c.bf16 %v895_v63, %v895_v63 }
 0x168   :  { %v731_v10 = vmul.f32 %v1828_v34, %v553_v6  ;;  %v763_v11 = vmul.f32 %v1828_v34, %v681_v7  ;;  %1186 = vst.msk [vmem:[#allocation10 + $0x6c] sm:$0xf] %vm1158_vm1, %v1401_v2  ;;  %1218 = vst.msk [vmem:[#allocation10 + $0xec] sm:$0xf] %vm1158_vm1, %v1433_v3  ;;  %v804_v14 = vadd.f32 %v1830_v36, %v733_v4 }
 0x169   :  { %v836_v15 = vadd.f32 %v1830_v36, %v765_v5  ;;  %v734_v16 = vmul.f32 %v1507_v12, %v1828_v34  ;;  %v766_v17 = vmul.f32 %v1539_v13, %v1828_v34  ;;  %1184 = vst.msk [vmem:[#allocation10 + $0x64] sm:$0xf] %vm1158_vm1, %v1399_v8  ;;  %1216 = vst.msk [vmem:[#allocation10 + $0xe4] sm:$0xf] %vm1158_vm1, %v1431_v9 }
 0x16a   :  { %v802_v20 = vadd.f32 %v1830_v36, %v731_v10  ;;  %v834_v21 = vadd.f32 %v1830_v36, %v763_v11  ;;  %v732_v22 = vmul.f32 %v1828_v34, %v556_v18  ;;  %v764_v23 = vmul.f32 %v1828_v34, %v684_v19 }
 0x16b   :  { %v868_v24 = vmax.f32 %v804_v14, 0.0  ;;  %v900_v25 = vmax.f32 %v836_v15, 0.0  ;;  %v805_v26 = vadd.f32 %v1830_v36, %v734_v16  ;;  %v837_v27 = vadd.f32 %v1830_v36, %v766_v17 }
 0x16c   :  { %v866_v28 = vmax.f32 %v802_v20, 0.0  ;;  %v898_v29 = vmax.f32 %v834_v21, 0.0  ;;  %v803_v30 = vadd.f32 %v1830_v36, %v732_v22  ;;  %v835_v31 = vadd.f32 %v1830_v36, %v764_v23 }
 0x16d   :  { %v1404_v32 = vpack.c.bf16 %v868_v24, %v868_v24  ;;  %v1436_v33 = vpack.c.bf16 %v900_v25, %v900_v25  ;;  %v869_v35 = vmax.f32 %v805_v26, 0.0  ;;  %v901_v37 = vmax.f32 %v837_v27, 0.0 }
 0x16e   :  { %v1402_v38 = vpack.c.bf16 %v866_v28, %v866_v28  ;;  %v1434_v34 = vpack.c.bf16 %v898_v29, %v898_v29  ;;  %v867_v39 = vmax.f32 %v803_v30, 0.0  ;;  %v899_v40 = vmax.f32 %v835_v31, 0.0 }
 0x16f   :  { %1189 = vst.msk [vmem:[#allocation10 + $0x78] sm:$0xf] %vm1158_vm1, %v1404_v32  ;;  %1221 = vst.msk [vmem:[#allocation10 + $0xf8] sm:$0xf] %vm1158_vm1, %v1436_v33  ;;  %v1405_v41 = vpack.c.bf16 %v869_v35, %v869_v35  ;;  %v1437_v42 = vpack.c.bf16 %v901_v37, %v901_v37 }
 0x170   :  { %1187 = vst.msk [vmem:[#allocation10 + $0x70] sm:$0xf] %vm1158_vm1, %v1402_v38  ;;  %1219 = vst.msk [vmem:[#allocation10 + $0xf0] sm:$0xf] %vm1158_vm1, %v1434_v34  ;;  %v1403_v36 = vpack.c.bf16 %v867_v39, %v867_v39  ;;  %v1435_v43 = vpack.c.bf16 %v899_v40, %v899_v40 }
 0x171   :  { %1190 = vst.msk [vmem:[#allocation10 + $0x7c] sm:$0xf] %vm1158_vm1, %v1405_v41  ;;  %1222 = vst.msk [vmem:[#allocation10 + $0xfc] sm:$0xf] %vm1158_vm1, %v1437_v42 }
 0x172   :  { %1188 = vst.msk [vmem:[#allocation10 + $0x74] sm:$0xf] %vm1158_vm1, %v1403_v36  ;;  %1220 = vst.msk [vmem:[#allocation10 + $0xf4] sm:$0xf] %vm1158_vm1, %v1435_v43 }
 0x173   :  { %1684 = shalt.err (!%p1681_p8)
}
 0x174   :  { %s1685_s17 = scalar_lea.hbm %s2043_s4, 4096 }
 0x175   :  { %p1686_p9 = scmp.ne.s32.totalorder %s2043_s4, %s1685_s17  ;;  %p1689_p10 = scmp.lt.u32.totalorder %s1685_s17, %s2043_s4 }
 0x177   :  { %p1691_p11 = pnand %p1689_p10, %p1686_p9 }
 0x179   :  { %1694 = shalt.err (!%p1691_p11)
}
 0x17a   :  { %1234 = dma.vmem_to_hbm [thread:$0]  %s1229_s13, 4096, %s2043_s4, [#allocation4], %s1705_s27, %s1705_s27, %s1706_s28  }
 0x17b   :  { %1701 = dma.done.wait [#allocation4], 4096  }
 0x17c   :  { %1702 = vsyncadd [#allocation4], 4294963200 }
 0x17d   :  { %1238 = vsyncpa [#allocation3], 1 }
 0x17e   :  { %1239 = vsyncpa [#allocation6], 1 }
 0x17f   :  { %1240 = vsyncpa [#allocation9], 1 }
 0x180   :  { %1241 = vsyncpa [#allocation4], 1 }

</bundles_post_ra>
